<compile_context>
chip_gen: v7x
topology: tpu7x:2x2x1
jax: 0.10.0
libtpu: 0.0.40
codegen_flags: <defaults>
</compile_context>

<pallas_src>
import jax
import jax.numpy as jnp
from jax.experimental import pallas as pl
from jax.experimental.pallas import tpu as pltpu

n_points = 100
n_stations = 2


def _sigmoid(x):
    # sigmoid(x) == 0.5 * tanh(0.5 * x) + 0.5  -> one EUP op per vreg.
    return 0.5 * jnp.tanh(0.5 * x) + 0.5


def ann_kernel(x_ref, p_ref, b3_ref, o_ref):
    # x_ref:  [1, N]        (dim_input == 1, samples on lanes)
    # p_ref:  [H, H+4]      packed params: [:, :H]=w2, [:,H]=w1, [:,H+1]=b1,
    #                       [:,H+2]=b2, [:,H+3]=w3 (as a column)
    # b3_ref: [1, 1] in SMEM
    # o_ref:  [1, N]
    H = p_ref.shape[0]

    x = x_ref[...]                              # [1, N]  f32
    w2 = p_ref[:, 0:H]                          # [H, H]
    w1 = p_ref[:, H:H + 1]                      # [H, 1]
    b1 = p_ref[:, H + 1:H + 2]                  # [H, 1]
    b2 = p_ref[:, H + 2:H + 3]                  # [H, 1]
    w3 = p_ref[:, H + 3:H + 4]                  # [H, 1]
    b3 = b3_ref[0, 0]                           # scalar from SMEM

    # Layer 1: K=1 contraction as a VPU broadcast outer product
    # ([H,1] * [1,N] -> [H,N]); no MXU round trip.
    h1 = _sigmoid(w1 * x + b1)

    # Layer 2: [H,H] @ [H,N] on the MXU, bf16 operands, f32 accumulate,
    # lane-dense result.  Bias add + sigmoid stay f32 on VPU/EUP.
    h2 = jnp.dot(w2.astype(jnp.bfloat16), h1.astype(jnp.bfloat16),
                 preferred_element_type=jnp.float32) + b2
    h2 = _sigmoid(h2)

    # Layer 3 (dim_output == 1): VPU mul + cross-sublane (XLU) reduce keeps the
    # result lane-dense [1, N] without a transpose or 1-row MXU output.
    out = jnp.sum(w3 * h2, axis=0, keepdims=True) + b3
    o_ref[...] = _sigmoid(out).astype(o_ref.dtype)


def pack_params(params):
    """Pack (w1,b1,w2,b2,w3,b3) into one [H, H+4] slab + a (1,1) SMEM scalar."""
    w1, b1, w2, b2, w3, b3 = params
    H = w2.shape[0]
    assert w1.shape == (H, 1), "layer-1 broadcast form assumes dim_input == 1"
    assert w3.shape == (1, H) and b3.shape == (1, 1), \
        "layer-3 reduce form assumes dim_output == 1"
    slab = jnp.zeros((H, H + 4), jnp.float32)
    slab = slab.at[:, 0:H].set(w2)
    slab = slab.at[:, H:H + 1].set(w1)
    slab = slab.at[:, H + 1:H + 2].set(b1)
    slab = slab.at[:, H + 2:H + 3].set(b2)
    slab = slab.at[:, H + 3:H + 4].set(w3.T)
    return slab, b3.astype(jnp.float32)


@jax.jit
def ann_forward(s, param_slab, b3):
    """s: any shape with n_points*n_stations elements (dim_input == 1)."""
    x = s.reshape(1, -1).astype(jnp.float32)    # [1, N], metadata-only reshape
    N = x.shape[1]
    assert N == n_points * n_stations, (N, n_points, n_stations)

    vmem = pl.BlockSpec(memory_space=pltpu.MemorySpace.VMEM)
    smem = pl.BlockSpec(memory_space=pltpu.MemorySpace.SMEM)

    out = pl.pallas_call(
        ann_kernel,
        out_shape=jax.ShapeDtypeStruct((1, N), jnp.float32),
        in_specs=[vmem, vmem, smem],
        out_specs=vmem,
    )(x, param_slab, b3)

    # [1, N] -> [n_points, n_stations]  (dim_output == 1)
    return out[0].reshape(n_points, n_stations)


def init_params(key, dim_input, dim_hidden, dim_output):
    """Deterministic init mimicking torch.nn.Linear (uniform +/- 1/sqrt(fan_in)).
    Weights stored PyTorch-style [out, in]; biases as [out, 1] columns."""
    k1, k2, k3, k4, k5, k6 = jax.random.split(key, 6)

    def linear(kw, kb, fan_in, fan_out):
        bound = 1.0 / jnp.sqrt(float(fan_in))
        w = jax.random.uniform(kw, (fan_out, fan_in), jnp.float32, -bound, bound)
        b = jax.random.uniform(kb, (fan_out, 1), jnp.float32, -bound, bound)
        return w, b

    w1, b1 = linear(k1, k2, dim_input, dim_hidden)
    w2, b2 = linear(k3, k4, dim_hidden, dim_hidden)
    w3, b3 = linear(k5, k6, dim_hidden, dim_output)
    return (w1, b1, w2, b2, w3, b3)


if __name__ == "__main__":
    dim_input, dim_hidden, dim_output = 1, 32, 1

    key = jax.random.PRNGKey(0)
    key_s, key_p = jax.random.split(key)

    # Input: one scalar per (point, station) -> 200 samples inside forward.
    s = jax.random.normal(key_s, (n_points, n_stations), dtype=jnp.float32)
    params = init_params(key_p, dim_input, dim_hidden, dim_output)
    param_slab, b3_smem = pack_params(params)

    out = ann_forward(s, param_slab, b3_smem)
    out = jax.block_until_ready(out)

    # Cross-check against a plain-JAX f32 reference in PyTorch's (sample-major)
    # orientation: y = sigmoid(x @ W.T + b).  Tolerance loosened for the bf16
    # MXU operands in layer 2.
    w1, b1, w2, b2, w3, b3 = params
    xr = s.reshape(-1, 1)
    ref = jax.nn.sigmoid(xr @ w1.T + b1.reshape(1, -1))
    ref = jax.nn.sigmoid(ref @ w2.T + b2.reshape(1, -1))
    ref = jax.nn.sigmoid(ref @ w3.T + b3.reshape(1, -1)).reshape(n_points, n_stations)

    assert out.shape == (n_points, n_stations), out.shape
    assert jnp.allclose(out, ref, atol=1e-2, rtol=1e-2), \
        float(jnp.max(jnp.abs(out - ref)))
    print("KERNEL_OK")
</pallas_src>

<mosaic_0001>
module attributes {stable_mosaic.version = 11 : i64} {
  func.func @ann_kernel(%arg0: memref<1x200xf32, #tpu.memory_space<vmem>>, %arg1: memref<32x36xf32, #tpu.memory_space<vmem>>, %arg2: memref<1x1xf32, #tpu.memory_space<smem>>, %arg3: memref<1x200xf32, #tpu.memory_space<vmem>>) attributes {dimension_semantics = [], scalar_prefetch = 0 : i64, scratch_operands = 0 : i64, tpu.core_type = #tpu.core_type<tc>} {
    %c0 = arith.constant 0 : index
    %c0_0 = arith.constant 0 : index
    %0 = vector.load %arg0[%c0, %c0_0] : memref<1x200xf32, #tpu.memory_space<vmem>>, vector<1x200xf32>
    %c0_1 = arith.constant 0 : index
    %c0_2 = arith.constant 0 : index
    %1 = vector.load %arg1[%c0_1, %c0_2] : memref<32x36xf32, #tpu.memory_space<vmem>>, vector<32x32xf32>
    %c0_3 = arith.constant 0 : index
    %c32 = arith.constant 32 : index
    %2 = vector.load %arg1[%c0_3, %c32] : memref<32x36xf32, #tpu.memory_space<vmem>>, vector<32x1xf32>
    %c0_4 = arith.constant 0 : index
    %c33 = arith.constant 33 : index
    %3 = vector.load %arg1[%c0_4, %c33] : memref<32x36xf32, #tpu.memory_space<vmem>>, vector<32x1xf32>
    %c0_5 = arith.constant 0 : index
    %c34 = arith.constant 34 : index
    %4 = vector.load %arg1[%c0_5, %c34] : memref<32x36xf32, #tpu.memory_space<vmem>>, vector<32x1xf32>
    %c0_6 = arith.constant 0 : index
    %c35 = arith.constant 35 : index
    %5 = vector.load %arg1[%c0_6, %c35] : memref<32x36xf32, #tpu.memory_space<vmem>>, vector<32x1xf32>
    %c0_7 = arith.constant 0 : index
    %c0_8 = arith.constant 0 : index
    %6 = memref.load %arg2[%c0_7, %c0_8] : memref<1x1xf32, #tpu.memory_space<smem>>
    %7 = vector.broadcast %2 : vector<32x1xf32> to vector<32x200xf32>
    %8 = vector.broadcast %0 : vector<1x200xf32> to vector<32x200xf32>
    %9 = arith.mulf %7, %8 : vector<32x200xf32>
    %10 = vector.broadcast %3 : vector<32x1xf32> to vector<32x200xf32>
    %11 = arith.addf %9, %10 : vector<32x200xf32>
    %cst = arith.constant 5.000000e-01 : f32
    %12 = vector.broadcast %cst : f32 to vector<32x200xf32>
    %13 = arith.mulf %12, %11 : vector<32x200xf32>
    %14 = math.tanh %13 : vector<32x200xf32>
    %cst_9 = arith.constant 5.000000e-01 : f32
    %15 = vector.broadcast %cst_9 : f32 to vector<32x200xf32>
    %16 = arith.mulf %15, %14 : vector<32x200xf32>
    %cst_10 = arith.constant 5.000000e-01 : f32
    %17 = vector.broadcast %cst_10 : f32 to vector<32x200xf32>
    %18 = arith.addf %16, %17 : vector<32x200xf32>
    %19 = arith.truncf %1 : vector<32x32xf32> to vector<32x32xbf16>
    %20 = arith.truncf %18 : vector<32x200xf32> to vector<32x200xbf16>
    %cst_11 = arith.constant dense<0.000000e+00> : vector<32x200xf32>
    %21 = tpu.matmul %19, %20, %cst_11 {dimension_numbers = #tpu.dot_dimension_numbers<[1], [0], [0], [1], [0, 0, 1, 1], [], []>} : vector<32x32xbf16>, vector<32x200xbf16>, vector<32x200xf32> -> vector<32x200xf32>
    %22 = vector.broadcast %4 : vector<32x1xf32> to vector<32x200xf32>
    %23 = arith.addf %21, %22 : vector<32x200xf32>
    %cst_12 = arith.constant 5.000000e-01 : f32
    %24 = vector.broadcast %cst_12 : f32 to vector<32x200xf32>
    %25 = arith.mulf %24, %23 : vector<32x200xf32>
    %26 = math.tanh %25 : vector<32x200xf32>
    %cst_13 = arith.constant 5.000000e-01 : f32
    %27 = vector.broadcast %cst_13 : f32 to vector<32x200xf32>
    %28 = arith.mulf %27, %26 : vector<32x200xf32>
    %cst_14 = arith.constant 5.000000e-01 : f32
    %29 = vector.broadcast %cst_14 : f32 to vector<32x200xf32>
    %30 = arith.addf %28, %29 : vector<32x200xf32>
    %31 = vector.broadcast %5 : vector<32x1xf32> to vector<32x200xf32>
    %32 = arith.mulf %31, %30 : vector<32x200xf32>
    %cst_15 = arith.constant dense<0.000000e+00> : vector<200xf32>
    %33 = vector.multi_reduction <add>, %32, %cst_15 [0] : vector<32x200xf32> to vector<200xf32>
    %34 = vector.shape_cast %33 : vector<200xf32> to vector<1x200xf32>
    %35 = vector.broadcast %6 : f32 to vector<1x200xf32>
    %36 = arith.addf %34, %35 : vector<1x200xf32>
    %cst_16 = arith.constant 5.000000e-01 : f32
    %37 = vector.broadcast %cst_16 : f32 to vector<1x200xf32>
    %38 = arith.mulf %37, %36 : vector<1x200xf32>
    %39 = math.tanh %38 : vector<1x200xf32>
    %cst_17 = arith.constant 5.000000e-01 : f32
    %40 = vector.broadcast %cst_17 : f32 to vector<1x200xf32>
    %41 = arith.mulf %40, %39 : vector<1x200xf32>
    %cst_18 = arith.constant 5.000000e-01 : f32
    %42 = vector.broadcast %cst_18 : f32 to vector<1x200xf32>
    %43 = arith.addf %41, %42 : vector<1x200xf32>
    %c0_19 = arith.constant 0 : index
    %c0_20 = arith.constant 0 : index
    %44 = vector.load %arg3[%c0_19, %c0_20] : memref<1x200xf32, #tpu.memory_space<vmem>>, vector<1x200xf32>
    tpu.vector_store %arg3[%c0_19, %c0_20], %43 {strides = array<i32>} : memref<1x200xf32, #tpu.memory_space<vmem>>, vector<1x200xf32>,
    return
  }
}

</mosaic_0001>

<bundles_post_ra>
// kernel: squeeze.1
= control target key start
LH: loop header
LB: loop body
LE: loop exit
PB: predicated region body
PF: predicated region fallthrough
CT: control target
= control target key end

     0   :  { %s622_s8 = smov 122   ;;  %s623_s9 = smov 124   ;;  %vm7_vm0 = vcmask 15360   ;;  %s1097_s0 = inlined_call_operand.vmem [shape: f32[200], index: 0, kind: input, shape index: {}]   ;;  %s1098_s1 = inlined_call_operand.vmem [shape: f32[100,2], index: 1, kind: output, shape index: {}]  }
   0x1   :  { %v4_v0 = vld [vmem:[%s1097_s0] sm:$0x3]  ;;  %s621_s0 = smov 126   ;;  %s624_s10 = smov 120  }
   0x2   :  { %5 = vst [vmem:[#allocation0] sm:$0x3] %v4_v0  ;;  %s625_s11 = smov 118   ;;  %s626_s12 = smov 116  }
   0x3   :  { %s627_s13 = smov 114   ;;  %s628_s14 = smov 112  }
   0x4   :  { %s629_s15 = smov 110   ;;  %s630_s16 = smov 108  }
   0x5   :  { %s631_s17 = smov 106   ;;  %s632_s18 = smov 104  }
   0x6   :  { %s633_s19 = smov 102   ;;  %s634_s20 = smov 100  }
   0x7   :  { %s635_s21 = smov 98   ;;  %s636_s22 = smov 96  }
   0x8   :  { %s637_s23 = smov 94   ;;  %s638_s24 = smov 92  }
   0x9   :  { %v11_v1 = vld [vmem:[#allocation0] sm:$0x3]   ;;  %s639_s25 = smov 90   ;;  %s640_s26 = smov 88  }
   0xa   :  { %v27_v2 = vld [vmem:[#allocation0] sm:$0x3]   ;;  %12 = vrot.lane.b32.xlu0 %v11_v1, %s621_s0  ;;  %s641_s27 = smov 86   ;;  %s642_s28 = smov 84  }
   0xb   :  { %28 = vrot.lane.b32.xlu1 %v27_v2, %s622_s8  ;;  %v19_v3 = vld [vmem:[#allocation0] sm:$0x3]   ;;  %s643_s29 = smov 82   ;;  %s644_s30 = smov 80  }
   0xc   :  { %v35_v4 = vld [vmem:[#allocation0] sm:$0x3]   ;;  %s645_s2 = smov 78   ;;  %s646_s3 = smov 76  }
   0xd   :  { %v43_v5 = vld [vmem:[#allocation0] sm:$0x3]   ;;  %s647_s4 = smov 74   ;;  %s648_s5 = smov 72  }
   0xe   :  { %20 = vrot.lane.b32.xlu0 %v19_v3, %s623_s9  ;;  %v51_v6 = vld [vmem:[#allocation0] sm:$0x3]   ;;  %s649_s6 = smov 70   ;;  %s650_s7 = smov 68  }
   0xf   :  { %36 = vrot.lane.b32.xlu1 %v35_v4, %s624_s10  ;;  %v59_v7 = vld [vmem:[#allocation0] sm:$0x3]   ;;  %s651_s0 = smov 66   ;;  %s652_s8 = smov 64  }
  0x10   :  { %v67_v8 = vld [vmem:[#allocation0] sm:$0x3]   ;;  %s653_s9 = smov 62   ;;  %s654_s10 = smov 60  }
  0x11   :  { %v75_v9 = vld [vmem:[#allocation0] sm:$0x3]  }
  0x12   :  { %44 = vrot.lane.b32.xlu0 %v43_v5, %s625_s11  ;;  %v83_v10 = vld [vmem:[#allocation0] sm:$0x3]   ;;  %s655_s11 = smov 58  }
  0x13   :  { %52 = vrot.lane.b32.xlu1 %v51_v6, %s626_s12  ;;  %v91_v11 = vld [vmem:[#allocation0] sm:$0x3]   ;;  %s656_s12 = smov 56  }
  0x14   :  { %v99_v12 = vld [vmem:[#allocation0] sm:$0x3]  }
  0x15   :  { %v107_v13 = vld [vmem:[#allocation0] sm:$0x3]  }
  0x16   :  { %60 = vrot.lane.b32.xlu0 %v59_v7, %s627_s13  ;;  %v115_v14 = vld [vmem:[#allocation0] sm:$0x3]   ;;  %s657_s13 = smov 54  }
  0x17   :  { %68 = vrot.lane.b32.xlu1 %v67_v8, %s628_s14  ;;  %v123_v15 = vld [vmem:[#allocation0] sm:$0x3]   ;;  %s658_s14 = smov 52  }
  0x18   :  { %v131_v16 = vld [vmem:[#allocation0] sm:$0x3]  }
  0x19   :  { %v139_v17 = vld [vmem:[#allocation0] sm:$0x3]  }
  0x1a   :  { %76 = vrot.lane.b32.xlu0 %v75_v9, %s629_s15  ;;  %v147_v18 = vld [vmem:[#allocation0] sm:$0x3]   ;;  %s659_s15 = smov 50  }
  0x1b   :  { %84 = vrot.lane.b32.xlu1 %v83_v10, %s630_s16  ;;  %v155_v19 = vld [vmem:[#allocation0] sm:$0x3]   ;;  %s660_s16 = smov 48  }
  0x1c   :  { %v163_v20 = vld [vmem:[#allocation0] sm:$0x3]  }
  0x1d   :  { %v171_v21 = vld [vmem:[#allocation0] sm:$0x3]  }
  0x1e   :  { %92 = vrot.lane.b32.xlu0 %v91_v11, %s631_s17  ;;  %v179_v22 = vld [vmem:[#allocation0] sm:$0x3]   ;;  %s661_s17 = smov 46  }
  0x1f   :  { %100 = vrot.lane.b32.xlu1 %v99_v12, %s632_s18  ;;  %v187_v23 = vld [vmem:[#allocation0] sm:$0x3]   ;;  %s662_s18 = smov 44  }
  0x20   :  { %v195_v24 = vld [vmem:[#allocation0] sm:$0x3]  }
  0x21   :  { %v203_v25 = vld [vmem:[#allocation0] sm:$0x3]  }
  0x22   :  { %108 = vrot.lane.b32.xlu0 %v107_v13, %s633_s19  ;;  %v211_v26 = vld [vmem:[#allocation0] sm:$0x3]   ;;  %s663_s19 = smov 42  }
  0x23   :  { %116 = vrot.lane.b32.xlu1 %v115_v14, %s634_s20  ;;  %v219_v27 = vld [vmem:[#allocation0] sm:$0x3]   ;;  %s664_s20 = smov 40  }
  0x24   :  { %v227_v28 = vld [vmem:[#allocation0] sm:$0x3]  }
  0x25   :  { %v235_v29 = vld [vmem:[#allocation0] sm:$0x3]  }
  0x26   :  { %124 = vrot.lane.b32.xlu0 %v123_v15, %s635_s21  ;;  %v243_v30 = vld [vmem:[#allocation0] sm:$0x3]   ;;  %s665_s21 = smov 38  }
  0x27   :  { %132 = vrot.lane.b32.xlu1 %v131_v16, %s636_s22  ;;  %v251_v31 = vld [vmem:[#allocation0] sm:$0x3]   ;;  %s666_s22 = smov 36  }
  0x28   :  { %v259_v32 = vld [vmem:[#allocation0] sm:$0x3]  }
  0x29   :  { %v267_v33 = vld [vmem:[#allocation0] sm:$0x3]  }
  0x2a   :  { %140 = vrot.lane.b32.xlu0 %v139_v17, %s637_s23  ;;  %v275_v34 = vld [vmem:[#allocation0] sm:$0x3]   ;;  %s667_s23 = smov 34  }
  0x2b   :  { %148 = vrot.lane.b32.xlu1 %v147_v18, %s638_s24  ;;  %v283_v35 = vld [vmem:[#allocation0] sm:$0x3]   ;;  %s668_s24 = smov 32  }
  0x2c   :  { %v291_v36 = vld [vmem:[#allocation0] sm:$0x1]  }
  0x2d   :  { %v297_v37 = vld [vmem:[#allocation0] sm:$0x1]  }
  0x2e   :  { %156 = vrot.lane.b32.xlu0 %v155_v19, %s639_s25  ;;  %v303_v38 = vld [vmem:[#allocation0] sm:$0x1]   ;;  %s669_s25 = smov 30  }
  0x2f   :  { %164 = vrot.lane.b32.xlu1 %v163_v20, %s640_s26  ;;  %v309_v39 = vld [vmem:[#allocation0] sm:$0x1]   ;;  %s670_s26 = smov 28  }
  0x30   :  { %v315_v40 = vld [vmem:[#allocation0] sm:$0x1]  }
  0x31   :  { %v321_v41 = vld [vmem:[#allocation0] sm:$0x1]  }
  0x32   :  { %172 = vrot.lane.b32.xlu0 %v171_v21, %s641_s27  ;;  %v327_v42 = vld [vmem:[#allocation0] sm:$0x1]   ;;  %s671_s27 = smov 26  }
  0x33   :  { %180 = vrot.lane.b32.xlu1 %v179_v22, %s642_s28  ;;  %v333_v43 = vld [vmem:[#allocation0] sm:$0x1]   ;;  %s672_s28 = smov 24  }
  0x34   :  { %v339_v44 = vld [vmem:[#allocation0] sm:$0x1]  }
  0x35   :  { %v345_v45 = vld [vmem:[#allocation0] sm:$0x1]  }
  0x36   :  { %188 = vrot.lane.b32.xlu0 %v187_v23, %s643_s29  ;;  %v351_v46 = vld [vmem:[#allocation0] sm:$0x1]   ;;  %s673_s29 = smov 22  }
  0x37   :  { %196 = vrot.lane.b32.xlu1 %v195_v24, %s644_s30  ;;  %v357_v47 = vld [vmem:[#allocation0] sm:$0x1]   ;;  %s674_s30 = smov 20  }
  0x38   :  { %v363_v48 = vld [vmem:[#allocation0] sm:$0x1]  }
  0x39   :  { %v369_v49 = vld [vmem:[#allocation0] sm:$0x1]  }
  0x3a   :  { %204 = vrot.lane.b32.xlu0 %v203_v25, %s645_s2  ;;  %v375_v50 = vld [vmem:[#allocation0] sm:$0x1]   ;;  %s675_s2 = smov 18  }
  0x3b   :  { %212 = vrot.lane.b32.xlu1 %v211_v26, %s646_s3  ;;  %v381_v51 = vld [vmem:[#allocation0] sm:$0x1]   ;;  %s676_s3 = smov 16  }
  0x3c   :  { %v387_v52 = vld [vmem:[#allocation0] sm:$0x1]  }
  0x3d   :  { %v393_v53 = vld [vmem:[#allocation0] sm:$0x1]  }
  0x3e   :  { %220 = vrot.lane.b32.xlu0 %v219_v27, %s647_s4  ;;  %v399_v54 = vld [vmem:[#allocation0] sm:$0x1]  }
  0x3f   :  { %228 = vrot.lane.b32.xlu1 %v227_v28, %s648_s5  ;;  %v405_v55 = vld [vmem:[#allocation0] sm:$0x1]  }
  0x40   :  { %v411_v56 = vld [vmem:[#allocation0] sm:$0x1]  }
  0x41   :  { %v417_v57 = vld [vmem:[#allocation0] sm:$0x1]  }
  0x42   :  { %236 = vrot.lane.b32.xlu0 %v235_v29, %s649_s6  ;;  %v423_v58 = vld [vmem:[#allocation0] sm:$0x1]  }
  0x43   :  { %244 = vrot.lane.b32.xlu1 %v243_v30, %s650_s7  ;;  %v6_v59 = vld [vmem:[#allocation0] sm:$0x3]  }
  0x44   :  { %8 = vst.msk [vmem:[%s1098_s1] sm:$0x1] %vm7_vm0, %v6_v59   ;;  %459 = vst.msk [vmem:[%s1098_s1 + $0x3f] sm:$0x2] %vm7_vm0, %v6_v59   ;;  %v429_v60 = vld [vmem:[#allocation0] sm:$0x1]  }
  0x45   :  { %v435_v61 = vld [vmem:[#allocation0] sm:$0x1]  }
  0x46   :  { %252 = vrot.lane.b32.xlu0 %v251_v31, %s651_s0  ;;  %s677_s0 = smov 14   ;;  %v441_v0 = vld [vmem:[#allocation0] sm:$0x1]  }
  0x47   :  { %260 = vrot.lane.b32.xlu1 %v259_v32, %s652_s8  ;;  %s678_s8 = smov 12   ;;  %v447_v1 = vld [vmem:[#allocation0] sm:$0x1]  }
  0x48   :  { %v453_v4 = vld [vmem:[#allocation0] sm:$0x1]  }
  0x4a   :  { %268 = vrot.lane.b32.xlu0 %v267_v33, %s653_s9 }
  0x4b   :  { %276 = vrot.lane.b32.xlu1 %v275_v34, %s654_s10 }
  0x4e   :  { %284 = vrot.lane.b32.xlu0 %v283_v35, %s655_s11 }
  0x4f   :  { %292 = vrot.lane.b32.xlu1 %v291_v36, %s656_s12 }
  0x52   :  { %298 = vrot.lane.b32.xlu0 %v297_v37, %s657_s13 }
  0x53   :  { %304 = vrot.lane.b32.xlu1 %v303_v38, %s658_s14 }
  0x56   :  { %310 = vrot.lane.b32.xlu0 %v309_v39, %s659_s15 }
  0x57   :  { %316 = vrot.lane.b32.xlu1 %v315_v40, %s660_s16 }
  0x5a   :  { %322 = vrot.lane.b32.xlu0 %v321_v41, %s661_s17  ;;  %s679_s17 = smov 10  }
  0x5b   :  { %328 = vrot.lane.b32.xlu1 %v327_v42, %s662_s18  ;;  %s680_s18 = smov 8  }
  0x5e   :  { %334 = vrot.lane.b32.xlu0 %v333_v43, %s663_s19 }
  0x5f   :  { %340 = vrot.lane.b32.xlu1 %v339_v44, %s664_s20 }
  0x62   :  { %346 = vrot.lane.b32.xlu0 %v345_v45, %s665_s21 }
  0x63   :  { %352 = vrot.lane.b32.xlu1 %v351_v46, %s666_s22 }
  0x66   :  { %358 = vrot.lane.b32.xlu0 %v357_v47, %s667_s23 }
  0x67   :  { %364 = vrot.lane.b32.xlu1 %v363_v48, %s668_s24 }
  0x6a   :  { %370 = vrot.lane.b32.xlu0 %v369_v49, %s669_s25 }
  0x6b   :  { %376 = vrot.lane.b32.xlu1 %v375_v50, %s670_s26 }
  0x6e   :  { %382 = vrot.lane.b32.xlu0 %v381_v51, %s671_s27  ;;  %s681_s27 = smov 6  }
  0x6f   :  { %388 = vrot.lane.b32.xlu1 %v387_v52, %s672_s28  ;;  %s682_s28 = smov 4  }
  0x72   :  { %394 = vrot.lane.b32.xlu0 %v393_v53, %s673_s29 }
  0x73   :  { %400 = vrot.lane.b32.xlu1 %v399_v54, %s674_s30 }
  0x76   :  { %406 = vrot.lane.b32.xlu0 %v405_v55, %s675_s2 }
  0x77   :  { %412 = vrot.lane.b32.xlu1 %v411_v56, %s676_s3 }
  0x7a   :  { %418 = vrot.lane.b32.xlu0 %v417_v57, %s677_s0  ;;  %s683_s0 = smov 2  }
  0x7b   :  { %424 = vrot.lane.b32.xlu1 %v423_v58, %s678_s8 }
  0x7c   :  { %v13_v62 = vpop.permute.xlu0 %12  }
  0x7d   :  { %v29_v63 = vpop.permute.xlu1 %28   ;;  %460 = vst.msk [vmem:[%s1098_s1 + $0x1] sm:$0x1] %vm7_vm0, %v13_v62   ;;  %461 = vst.msk [vmem:[%s1098_s1 + $0x40] sm:$0x2] %vm7_vm0, %v13_v62  }
  0x7e   :  { %464 = vst.msk [vmem:[%s1098_s1 + $0x3] sm:$0x1] %vm7_vm0, %v29_v63   ;;  %465 = vst.msk [vmem:[%s1098_s1 + $0x42] sm:$0x2] %vm7_vm0, %v29_v63   ;;  %430 = vrot.lane.b32.xlu0 %v429_v60, %s679_s17 }
  0x7f   :  { %436 = vrot.lane.b32.xlu1 %v435_v61, %s680_s18 }
  0x80   :  { %v21_v2 = vpop.permute.xlu0 %20  }
  0x81   :  { %v37_v3 = vpop.permute.xlu1 %36   ;;  %462 = vst.msk [vmem:[%s1098_s1 + $0x2] sm:$0x1] %vm7_vm0, %v21_v2   ;;  %463 = vst.msk [vmem:[%s1098_s1 + $0x41] sm:$0x2] %vm7_vm0, %v21_v2  }
  0x82   :  { %466 = vst.msk [vmem:[%s1098_s1 + $0x4] sm:$0x1] %vm7_vm0, %v37_v3   ;;  %467 = vst.msk [vmem:[%s1098_s1 + $0x43] sm:$0x2] %vm7_vm0, %v37_v3   ;;  %442 = vrot.lane.b32.xlu0 %v441_v0, %s681_s27 }
  0x83   :  { %448 = vrot.lane.b32.xlu1 %v447_v1, %s682_s28 }
  0x84   :  { %v45_v5 = vpop.permute.xlu0 %44  }
  0x85   :  { %v53_v6 = vpop.permute.xlu1 %52   ;;  %468 = vst.msk [vmem:[%s1098_s1 + $0x5] sm:$0x1] %vm7_vm0, %v45_v5   ;;  %469 = vst.msk [vmem:[%s1098_s1 + $0x44] sm:$0x2] %vm7_vm0, %v45_v5  }
  0x86   :  { %470 = vst.msk [vmem:[%s1098_s1 + $0x6] sm:$0x1] %vm7_vm0, %v53_v6   ;;  %471 = vst.msk [vmem:[%s1098_s1 + $0x45] sm:$0x2] %vm7_vm0, %v53_v6   ;;  %454 = vrot.lane.b32.xlu0 %v453_v4, %s683_s0 }
  0x88   :  { %v61_v7 = vpop.permute.xlu0 %60  }
  0x89   :  { %v69_v8 = vpop.permute.xlu1 %68   ;;  %472 = vst.msk [vmem:[%s1098_s1 + $0x7] sm:$0x1] %vm7_vm0, %v61_v7   ;;  %473 = vst.msk [vmem:[%s1098_s1 + $0x46] sm:$0x2] %vm7_vm0, %v61_v7  }
  0x8a   :  { %474 = vst.msk [vmem:[%s1098_s1 + $0x8] sm:$0x1] %vm7_vm0, %v69_v8   ;;  %475 = vst.msk [vmem:[%s1098_s1 + $0x47] sm:$0x2] %vm7_vm0, %v69_v8  }
  0x8c   :  { %v77_v9 = vpop.permute.xlu0 %76  }
  0x8d   :  { %v85_v10 = vpop.permute.xlu1 %84   ;;  %476 = vst.msk [vmem:[%s1098_s1 + $0x9] sm:$0x1] %vm7_vm0, %v77_v9   ;;  %477 = vst.msk [vmem:[%s1098_s1 + $0x48] sm:$0x2] %vm7_vm0, %v77_v9  }
  0x8e   :  { %478 = vst.msk [vmem:[%s1098_s1 + $0xa] sm:$0x1] %vm7_vm0, %v85_v10   ;;  %479 = vst.msk [vmem:[%s1098_s1 + $0x49] sm:$0x2] %vm7_vm0, %v85_v10  }
  0x90   :  { %v93_v11 = vpop.permute.xlu0 %92  }
  0x91   :  { %v101_v12 = vpop.permute.xlu1 %100   ;;  %480 = vst.msk [vmem:[%s1098_s1 + $0xb] sm:$0x1] %vm7_vm0, %v93_v11   ;;  %481 = vst.msk [vmem:[%s1098_s1 + $0x4a] sm:$0x2] %vm7_vm0, %v93_v11  }
  0x92   :  { %482 = vst.msk [vmem:[%s1098_s1 + $0xc] sm:$0x1] %vm7_vm0, %v101_v12   ;;  %483 = vst.msk [vmem:[%s1098_s1 + $0x4b] sm:$0x2] %vm7_vm0, %v101_v12  }
  0x94   :  { %v109_v13 = vpop.permute.xlu0 %108  }
  0x95   :  { %v117_v14 = vpop.permute.xlu1 %116   ;;  %484 = vst.msk [vmem:[%s1098_s1 + $0xd] sm:$0x1] %vm7_vm0, %v109_v13   ;;  %485 = vst.msk [vmem:[%s1098_s1 + $0x4c] sm:$0x2] %vm7_vm0, %v109_v13  }
  0x96   :  { %486 = vst.msk [vmem:[%s1098_s1 + $0xe] sm:$0x1] %vm7_vm0, %v117_v14   ;;  %487 = vst.msk [vmem:[%s1098_s1 + $0x4d] sm:$0x2] %vm7_vm0, %v117_v14  }
  0x98   :  { %v125_v15 = vpop.permute.xlu0 %124  }
  0x99   :  { %v133_v16 = vpop.permute.xlu1 %132   ;;  %488 = vst.msk [vmem:[%s1098_s1 + $0xf] sm:$0x1] %vm7_vm0, %v125_v15   ;;  %489 = vst.msk [vmem:[%s1098_s1 + $0x4e] sm:$0x2] %vm7_vm0, %v125_v15  }
  0x9a   :  { %490 = vst.msk [vmem:[%s1098_s1 + $0x10] sm:$0x1] %vm7_vm0, %v133_v16   ;;  %491 = vst.msk [vmem:[%s1098_s1 + $0x4f] sm:$0x2] %vm7_vm0, %v133_v16  }
  0x9c   :  { %v141_v17 = vpop.permute.xlu0 %140  }
  0x9d   :  { %v149_v18 = vpop.permute.xlu1 %148   ;;  %492 = vst.msk [vmem:[%s1098_s1 + $0x11] sm:$0x1] %vm7_vm0, %v141_v17   ;;  %493 = vst.msk [vmem:[%s1098_s1 + $0x50] sm:$0x2] %vm7_vm0, %v141_v17  }
  0x9e   :  { %494 = vst.msk [vmem:[%s1098_s1 + $0x12] sm:$0x1] %vm7_vm0, %v149_v18   ;;  %495 = vst.msk [vmem:[%s1098_s1 + $0x51] sm:$0x2] %vm7_vm0, %v149_v18  }
  0xa0   :  { %v157_v19 = vpop.permute.xlu0 %156  }
  0xa1   :  { %v165_v20 = vpop.permute.xlu1 %164   ;;  %496 = vst.msk [vmem:[%s1098_s1 + $0x13] sm:$0x1] %vm7_vm0, %v157_v19   ;;  %497 = vst.msk [vmem:[%s1098_s1 + $0x52] sm:$0x2] %vm7_vm0, %v157_v19  }
  0xa2   :  { %498 = vst.msk [vmem:[%s1098_s1 + $0x14] sm:$0x1] %vm7_vm0, %v165_v20   ;;  %499 = vst.msk [vmem:[%s1098_s1 + $0x53] sm:$0x2] %vm7_vm0, %v165_v20  }
  0xa4   :  { %v173_v21 = vpop.permute.xlu0 %172  }
  0xa5   :  { %v181_v22 = vpop.permute.xlu1 %180   ;;  %500 = vst.msk [vmem:[%s1098_s1 + $0x15] sm:$0x1] %vm7_vm0, %v173_v21   ;;  %501 = vst.msk [vmem:[%s1098_s1 + $0x54] sm:$0x2] %vm7_vm0, %v173_v21  }
  0xa6   :  { %502 = vst.msk [vmem:[%s1098_s1 + $0x16] sm:$0x1] %vm7_vm0, %v181_v22   ;;  %503 = vst.msk [vmem:[%s1098_s1 + $0x55] sm:$0x2] %vm7_vm0, %v181_v22  }
  0xa8   :  { %v189_v23 = vpop.permute.xlu0 %188  }
  0xa9   :  { %v197_v24 = vpop.permute.xlu1 %196   ;;  %504 = vst.msk [vmem:[%s1098_s1 + $0x17] sm:$0x1] %vm7_vm0, %v189_v23   ;;  %505 = vst.msk [vmem:[%s1098_s1 + $0x56] sm:$0x2] %vm7_vm0, %v189_v23  }
  0xaa   :  { %506 = vst.msk [vmem:[%s1098_s1 + $0x18] sm:$0x1] %vm7_vm0, %v197_v24   ;;  %507 = vst.msk [vmem:[%s1098_s1 + $0x57] sm:$0x2] %vm7_vm0, %v197_v24  }
  0xac   :  { %v205_v25 = vpop.permute.xlu0 %204  }
  0xad   :  { %v213_v26 = vpop.permute.xlu1 %212   ;;  %508 = vst.msk [vmem:[%s1098_s1 + $0x19] sm:$0x1] %vm7_vm0, %v205_v25   ;;  %509 = vst.msk [vmem:[%s1098_s1 + $0x58] sm:$0x2] %vm7_vm0, %v205_v25  }
  0xae   :  { %510 = vst.msk [vmem:[%s1098_s1 + $0x1a] sm:$0x1] %vm7_vm0, %v213_v26   ;;  %511 = vst.msk [vmem:[%s1098_s1 + $0x59] sm:$0x2] %vm7_vm0, %v213_v26  }
  0xb0   :  { %v221_v27 = vpop.permute.xlu0 %220  }
  0xb1   :  { %v229_v28 = vpop.permute.xlu1 %228   ;;  %512 = vst.msk [vmem:[%s1098_s1 + $0x1b] sm:$0x1] %vm7_vm0, %v221_v27   ;;  %513 = vst.msk [vmem:[%s1098_s1 + $0x5a] sm:$0x2] %vm7_vm0, %v221_v27  }
  0xb2   :  { %514 = vst.msk [vmem:[%s1098_s1 + $0x1c] sm:$0x1] %vm7_vm0, %v229_v28   ;;  %515 = vst.msk [vmem:[%s1098_s1 + $0x5b] sm:$0x2] %vm7_vm0, %v229_v28  }
  0xb4   :  { %v237_v29 = vpop.permute.xlu0 %236  }
  0xb5   :  { %v245_v30 = vpop.permute.xlu1 %244   ;;  %516 = vst.msk [vmem:[%s1098_s1 + $0x1d] sm:$0x1] %vm7_vm0, %v237_v29   ;;  %517 = vst.msk [vmem:[%s1098_s1 + $0x5c] sm:$0x2] %vm7_vm0, %v237_v29  }
  0xb6   :  { %518 = vst.msk [vmem:[%s1098_s1 + $0x1e] sm:$0x1] %vm7_vm0, %v245_v30   ;;  %519 = vst.msk [vmem:[%s1098_s1 + $0x5d] sm:$0x2] %vm7_vm0, %v245_v30  }
  0xb8   :  { %v253_v31 = vpop.permute.xlu0 %252  }
  0xb9   :  { %v261_v32 = vpop.permute.xlu1 %260   ;;  %520 = vst.msk [vmem:[%s1098_s1 + $0x1f] sm:$0x1] %vm7_vm0, %v253_v31   ;;  %521 = vst.msk [vmem:[%s1098_s1 + $0x5e] sm:$0x2] %vm7_vm0, %v253_v31  }
  0xba   :  { %522 = vst.msk [vmem:[%s1098_s1 + $0x20] sm:$0x1] %vm7_vm0, %v261_v32   ;;  %523 = vst.msk [vmem:[%s1098_s1 + $0x5f] sm:$0x2] %vm7_vm0, %v261_v32  }
  0xbc   :  { %v269_v33 = vpop.permute.xlu0 %268  }
  0xbd   :  { %v277_v34 = vpop.permute.xlu1 %276   ;;  %524 = vst.msk [vmem:[%s1098_s1 + $0x21] sm:$0x1] %vm7_vm0, %v269_v33   ;;  %525 = vst.msk [vmem:[%s1098_s1 + $0x60] sm:$0x2] %vm7_vm0, %v269_v33  }
  0xbe   :  { %526 = vst.msk [vmem:[%s1098_s1 + $0x22] sm:$0x1] %vm7_vm0, %v277_v34   ;;  %527 = vst.msk [vmem:[%s1098_s1 + $0x61] sm:$0x2] %vm7_vm0, %v277_v34  }
  0xc0   :  { %v285_v35 = vpop.permute.xlu0 %284  }
  0xc1   :  { %v293_v36 = vpop.permute.xlu1 %292   ;;  %528 = vst.msk [vmem:[%s1098_s1 + $0x23] sm:$0x1] %vm7_vm0, %v285_v35   ;;  %529 = vst.msk [vmem:[%s1098_s1 + $0x62] sm:$0x2] %vm7_vm0, %v285_v35  }
  0xc2   :  { %530 = vst.msk [vmem:[%s1098_s1 + $0x24] sm:$0x1] %vm7_vm0, %v293_v36  }
  0xc4   :  { %v299_v37 = vpop.permute.xlu0 %298  }
  0xc5   :  { %v305_v38 = vpop.permute.xlu1 %304   ;;  %531 = vst.msk [vmem:[%s1098_s1 + $0x25] sm:$0x1] %vm7_vm0, %v299_v37  }
  0xc6   :  { %532 = vst.msk [vmem:[%s1098_s1 + $0x26] sm:$0x1] %vm7_vm0, %v305_v38  }
  0xc8   :  { %v311_v39 = vpop.permute.xlu0 %310  }
  0xc9   :  { %v317_v40 = vpop.permute.xlu1 %316   ;;  %533 = vst.msk [vmem:[%s1098_s1 + $0x27] sm:$0x1] %vm7_vm0, %v311_v39  }
  0xca   :  { %534 = vst.msk [vmem:[%s1098_s1 + $0x28] sm:$0x1] %vm7_vm0, %v317_v40  }
  0xcc   :  { %v323_v41 = vpop.permute.xlu0 %322  }
  0xcd   :  { %v329_v42 = vpop.permute.xlu1 %328   ;;  %535 = vst.msk [vmem:[%s1098_s1 + $0x29] sm:$0x1] %vm7_vm0, %v323_v41  }
  0xce   :  { %536 = vst.msk [vmem:[%s1098_s1 + $0x2a] sm:$0x1] %vm7_vm0, %v329_v42  }
  0xd0   :  { %v335_v43 = vpop.permute.xlu0 %334  }
  0xd1   :  { %v341_v44 = vpop.permute.xlu1 %340   ;;  %537 = vst.msk [vmem:[%s1098_s1 + $0x2b] sm:$0x1] %vm7_vm0, %v335_v43  }
  0xd2   :  { %538 = vst.msk [vmem:[%s1098_s1 + $0x2c] sm:$0x1] %vm7_vm0, %v341_v44  }
  0xd4   :  { %v347_v45 = vpop.permute.xlu0 %346  }
  0xd5   :  { %v353_v46 = vpop.permute.xlu1 %352   ;;  %539 = vst.msk [vmem:[%s1098_s1 + $0x2d] sm:$0x1] %vm7_vm0, %v347_v45  }
  0xd6   :  { %540 = vst.msk [vmem:[%s1098_s1 + $0x2e] sm:$0x1] %vm7_vm0, %v353_v46  }
  0xd8   :  { %v359_v47 = vpop.permute.xlu0 %358  }
  0xd9   :  { %v365_v48 = vpop.permute.xlu1 %364   ;;  %541 = vst.msk [vmem:[%s1098_s1 + $0x2f] sm:$0x1] %vm7_vm0, %v359_v47  }
  0xda   :  { %542 = vst.msk [vmem:[%s1098_s1 + $0x30] sm:$0x1] %vm7_vm0, %v365_v48  }
  0xdc   :  { %v371_v49 = vpop.permute.xlu0 %370  }
  0xdd   :  { %v377_v50 = vpop.permute.xlu1 %376   ;;  %543 = vst.msk [vmem:[%s1098_s1 + $0x31] sm:$0x1] %vm7_vm0, %v371_v49  }
  0xde   :  { %544 = vst.msk [vmem:[%s1098_s1 + $0x32] sm:$0x1] %vm7_vm0, %v377_v50  }
  0xe0   :  { %v383_v51 = vpop.permute.xlu0 %382  }
  0xe1   :  { %v389_v52 = vpop.permute.xlu1 %388   ;;  %545 = vst.msk [vmem:[%s1098_s1 + $0x33] sm:$0x1] %vm7_vm0, %v383_v51  }
  0xe2   :  { %546 = vst.msk [vmem:[%s1098_s1 + $0x34] sm:$0x1] %vm7_vm0, %v389_v52  }
  0xe4   :  { %v395_v53 = vpop.permute.xlu0 %394  }
  0xe5   :  { %v401_v54 = vpop.permute.xlu1 %400   ;;  %547 = vst.msk [vmem:[%s1098_s1 + $0x35] sm:$0x1] %vm7_vm0, %v395_v53  }
  0xe6   :  { %548 = vst.msk [vmem:[%s1098_s1 + $0x36] sm:$0x1] %vm7_vm0, %v401_v54  }
  0xe8   :  { %v407_v55 = vpop.permute.xlu0 %406  }
  0xe9   :  { %v413_v56 = vpop.permute.xlu1 %412   ;;  %549 = vst.msk [vmem:[%s1098_s1 + $0x37] sm:$0x1] %vm7_vm0, %v407_v55  }
  0xea   :  { %550 = vst.msk [vmem:[%s1098_s1 + $0x38] sm:$0x1] %vm7_vm0, %v413_v56  }
  0xec   :  { %v419_v57 = vpop.permute.xlu0 %418  }
  0xed   :  { %v425_v58 = vpop.permute.xlu1 %424   ;;  %551 = vst.msk [vmem:[%s1098_s1 + $0x39] sm:$0x1] %vm7_vm0, %v419_v57  }
  0xee   :  { %552 = vst.msk [vmem:[%s1098_s1 + $0x3a] sm:$0x1] %vm7_vm0, %v425_v58  }
  0xf0   :  { %v431_v59 = vpop.permute.xlu0 %430  }
  0xf1   :  { %v437_v60 = vpop.permute.xlu1 %436   ;;  %553 = vst.msk [vmem:[%s1098_s1 + $0x3b] sm:$0x1] %vm7_vm0, %v431_v59  }
  0xf2   :  { %554 = vst.msk [vmem:[%s1098_s1 + $0x3c] sm:$0x1] %vm7_vm0, %v437_v60  }
  0xf4   :  { %v443_v61 = vpop.permute.xlu0 %442  }
  0xf5   :  { %v449_v62 = vpop.permute.xlu1 %448   ;;  %555 = vst.msk [vmem:[%s1098_s1 + $0x3d] sm:$0x1] %vm7_vm0, %v443_v61  }
  0xf6   :  { %556 = vst.msk [vmem:[%s1098_s1 + $0x3e] sm:$0x1] %vm7_vm0, %v449_v62  }
  0xf8   :  { %v455_v63 = vpop.permute.xlu0 %454  }
  0xf9   :  { %557 = vst.msk [vmem:[%s1098_s1 + $0x3f] sm:$0x1] %vm7_vm0, %v455_v63  }

// kernel: ann_forward.1
= control target key start
LH: loop header
LB: loop body
LE: loop exit
PB: predicated region body
PF: predicated region fallthrough
CT: control target
= control target key end

     0   :  { %v373_v0 = vmov 33   ;;  %v374_v1 = vmov 32   ;;  %v375_v7 = vmov 0   ;;  %v376_v9 = vmov 34   ;;  %s465_s1 = inlined_call_operand.vmem [shape: f32[32,36], index: 1, kind: input, shape index: {}]   ;;  %s466_s0 = inlined_call_operand.vmem [shape: f32[1,200], index: 0, kind: input, shape index: {}]   ;;  %s467_s2 = inlined_call_operand.<no memory space> [shape: f32[1,1], index: 2, kind: input, shape index: {}]   ;;  %s468_s3 = inlined_call_operand.vmem [shape: f32[1,200], index: 3, kind: output, shape index: {}]  }
   0x1   :  { %329 = vset.pattern.permute.xlu1 %v373_v0  ;;  %328 = vset.pattern.permute.xlu0 %v374_v1  ;;  %v402_v2 = vld [vmem:[%s465_s1] sm:$0xff]  ;;  %v409_v3 = vld [vmem:[%s465_s1 + $0x8] sm:$0xff]  ;;  %v416_v4 = vld [vmem:[%s465_s1 + $0x10] sm:$0xff]  ;;  %v377_v10 = vmov 35   ;;  %v43_v11 = vlaneseq  ;;  %vm139_vm0 = vcmask 261120   ;;  %vm264_vm1 = vcmask 588800  }
   0x2   :  { %62 = vperm.xlu1 %329, %v402_v2   ;;  %24 = vperm.xlu0 %328, %v402_v2   ;;  %v421_v5 = vld [vmem:[%s465_s1 + $0x18] sm:$0xff]  ;;  %v117_v6 = vpack.c.bf16 %v409_v3, %v402_v2  ;;  %v16_v15 = vld [vmem:[%s466_s0] sm:$0x3] }
   0x3   :  { %178 = vmatprep.mubr.bf16.mxu0 %v375_v7  ;;  %188 = vmatprep.mubr.bf16.mxu1 %v375_v7  ;;  %v118_v8 = vpack.c.bf16 %v421_v5, %v416_v4  ;;  %v440_v12 = vshrl.u32 %v43_v11, 7  ;;  %vm309_vm2 = vcmp.lt.s32.totalorder %v43_v11, 200 }
   0x5   :  { %v45_v13 = vsub.s32 0, %v440_v12  ;;  %v49_v14 = vsub.s32 1, %v440_v12 }
   0x6   :  { %66 = vperm.xlu1 %329, %v409_v3   ;;  %29 = vperm.xlu0 %328, %v409_v3  }
   0x7   :  { %v46_v16 = vrot.slane %v16_v15, %v45_v13  ;;  %v50_v17 = vrot.slane %v16_v15, %v49_v14 }
   0xa   :  { %330 = vset.pattern.permute.xlu1 %v374_v1  ;;  %34 = vperm.xlu0 %328, %v416_v4  }
   0xb   :  { %39 = vperm.xlu1 %330, %v421_v5  }
   0xe   :  { %331 = vset.pattern.permute.xlu0 %v373_v0 }
   0xf   :  { %332 = vset.pattern.permute.xlu1 %v373_v0  ;;  %70 = vperm.xlu0 %331, %v416_v4  }
  0x10   :  { %74 = vperm.xlu1 %332, %v421_v5  }
  0x13   :  { %334 = vset.pattern.permute.xlu0 %v376_v9 }
  0x14   :  { %333 = vset.pattern.permute.xlu1 %v376_v9  ;;  %128 = vperm.xlu0 %334, %v409_v3  }
  0x15   :  { %124 = vperm.xlu1 %333, %v402_v2  }
  0x18   :  { %335 = vset.pattern.permute.xlu0 %v377_v10 }
  0x19   :  { %132 = vperm.xlu1 %333, %v416_v4   ;;  %232 = vperm.xlu0 %335, %v402_v2  }
  0x1d   :  { %136 = vperm.xlu1 %333, %v421_v5   ;;  %244 = vperm.xlu0 %335, %v421_v5  }
  0x21   :  { %336 = vset.pattern.permute.xlu1 %v377_v10 }
  0x22   :  { %236 = vperm.xlu1 %336, %v409_v3  }
  0x26   :  { %240 = vperm.xlu1 %336, %v416_v4  }
  0x81   :  { %v63_v18 = vpop.permute.xlu1 %62  ;;  %v25_v19 = vpop.permute.xlu0 %24 }
  0x82   :  { %v53_v20 = vmul.f32 %v46_v16, %v25_v19  ;;  %v54_v21 = vmul.f32 %v50_v17, %v25_v19 }
  0x84   :  { %v77_v22 = vadd.f32 %v63_v18, %v53_v20  ;;  %v78_v23 = vadd.f32 %v63_v18, %v54_v21 }
  0x85   :  { %v67_v24 = vpop.permute.xlu1 %66  ;;  %v30_v25 = vpop.permute.xlu0 %29 }
  0x86   :  { %v85_v26 = vmul.f32 0.5, %v77_v22  ;;  %v86_v27 = vmul.f32 0.5, %v78_v23  ;;  %v55_v28 = vmul.f32 %v46_v16, %v30_v25  ;;  %v56_v29 = vmul.f32 %v50_v17, %v30_v25 }
  0x88   :  { %337 = vtanh.f32 %v85_v26  ;;  %v79_v30 = vadd.f32 %v67_v24, %v55_v28  ;;  %v80_v31 = vadd.f32 %v67_v24, %v56_v29 }
  0x89   :  { %339 = vtanh.f32 %v86_v27  ;;  %v35_v32 = vpop.permute.xlu0 %34 }
  0x8a   :  { %v87_v33 = vmul.f32 0.5, %v79_v30  ;;  %v88_v34 = vmul.f32 0.5, %v80_v31  ;;  %v40_v35 = vpop.permute.xlu1 %39  ;;  %v57_v36 = vmul.f32 %v46_v16, %v35_v32  ;;  %v58_v37 = vmul.f32 %v50_v17, %v35_v32 }
  0x8b   :  { %v59_v38 = vmul.f32 %v46_v16, %v40_v35  ;;  %v60_v39 = vmul.f32 %v50_v17, %v40_v35 }
  0x8c   :  { %341 = vtanh.f32 %v87_v33 }
  0x8d   :  { %343 = vtanh.f32 %v88_v34 }
  0x8e   :  { %v71_v40 = vpop.permute.xlu0 %70 }
  0x8f   :  { %v81_v41 = vadd.f32 %v71_v40, %v57_v36  ;;  %v82_v42 = vadd.f32 %v71_v40, %v58_v37  ;;  %v75_v43 = vpop.permute.xlu1 %74 }
  0x90   :  { %v83_v44 = vadd.f32 %v75_v43, %v59_v38  ;;  %v84_v45 = vadd.f32 %v75_v43, %v60_v39 }
  0x91   :  { %v89_v46 = vmul.f32 0.5, %v81_v41  ;;  %v90_v47 = vmul.f32 0.5, %v82_v42 }
  0x92   :  { %v338_v48 = vpop.eup %337  ;;  %v91_v49 = vmul.f32 0.5, %v83_v44  ;;  %v92_v50 = vmul.f32 0.5, %v84_v45 }
  0x93   :  { %v340_v51 = vpop.eup %339  ;;  %345 = vtanh.f32 %v89_v46  ;;  %v101_v52 = vmul.f32 0.5, %v338_v48  ;;  %v129_v25 = vpop.permute.xlu0 %128 }
  0x94   :  { %347 = vtanh.f32 %v90_v47  ;;  %v102_v54 = vmul.f32 0.5, %v340_v51  ;;  %v125_v22 = vpop.permute.xlu1 %124 }
  0x95   :  { %349 = vtanh.f32 %v91_v49  ;;  %v109_v58 = vadd.f32 0.5, %v101_v52 }
  0x96   :  { %v342_v53 = vpop.eup %341  ;;  %351 = vtanh.f32 %v92_v50  ;;  %v110_v60 = vadd.f32 0.5, %v102_v54 }
  0x97   :  { %v344_v55 = vpop.eup %343  ;;  %v103_v56 = vmul.f32 0.5, %v342_v53 }
  0x98   :  { %v104_v57 = vmul.f32 0.5, %v344_v55  ;;  %v133_v23 = vpop.permute.xlu1 %132  ;;  %v233_v53 = vpop.permute.xlu0 %232 }
  0x99   :  { %v111_v59 = vadd.f32 0.5, %v103_v56 }
  0x9a   :  { %v112_v61 = vadd.f32 0.5, %v104_v57 }
  0x9b   :  { %v119_v62 = vpack.c.bf16 %v111_v59, %v109_v58 }
  0x9c   :  { %v120_v63 = vpack.c.bf16 %v112_v61, %v110_v60  ;;  %v137_v24 = vpop.permute.xlu1 %136 }
  0x9d   :  { %v346_v0 = vpop.eup %345 }
  0x9e   :  { %v348_v1 = vpop.eup %347  ;;  %v105_v7 = vmul.f32 0.5, %v346_v0  ;;  %146 = vmatprep.subr.bf16.mxu0 %v120_v63  ;;  %318 = vmatprep.subr.bf16.mxu1 %v120_v63 }
  0x9f   :  { %v350_v9 = vpop.eup %349  ;;  %v106_v10 = vmul.f32 0.5, %v348_v1  ;;  %147 = vmatpush1.bf16.msra.mxu0 %v119_v62  ;;  %320 = vmatpush1.bf16.msra.mxu1 %v119_v62 }
  0xa0   :  { %v352_v13 = vpop.eup %351  ;;  %v107_v14 = vmul.f32 0.5, %v350_v9  ;;  %v113_v15 = vadd.f32 0.5, %v105_v7 }
  0xa1   :  { %v108_v16 = vmul.f32 0.5, %v352_v13  ;;  %v114_v17 = vadd.f32 0.5, %v106_v10  ;;  %v237_v48 = vpop.permute.xlu1 %236 }
  0xa2   :  { %v115_v18 = vadd.f32 0.5, %v107_v14 }
  0xa3   :  { %v116_v19 = vadd.f32 0.5, %v108_v16 }
  0xa4   :  { %v121_v20 = vpack.c.bf16 %v115_v18, %v113_v15 }
  0xa5   :  { %v122_v21 = vpack.c.bf16 %v116_v19, %v114_v17  ;;  %v241_v9 = vpop.permute.xlu1 %240  ;;  %v245_v17 = vpop.permute.xlu0 %244 }
  0xa7   :  { %148 = vmatprep.subr.bf16.mxu0 %v122_v21  ;;  %319 = vmatprep.subr.bf16.mxu1 %v122_v21 }
  0xa8   :  { %149 = vmatpush1.bf16.msra.mxu0 %v121_v20  ;;  %321 = vmatpush1.bf16.msra.mxu1 %v121_v20 }
  0xab   :  { %316 = vmatmul.mubr.msk.bf16.vlgmr.msra.gmra.mrb[0].mxu0 %vm139_vm0, %v117_v6  ;;  %317 = vmatmul.mubr.msk.bf16.vlgmr.msra.gmra.mrb[0].mxu1 %vm139_vm0, %v118_v8 }
 0x17e   :  { %v180_v26 = vpop.f32.mrb[0].mxu0  ;;  %v190_v27 = vpop.f32.mrb[0].mxu1 }
 0x17f   :  { %v181_v28 = vadd.f32 %v180_v26, %v125_v22  ;;  %v191_v29 = vadd.f32 %v190_v27, %v133_v23  ;;  %v182_v30 = vpop.f32.mrb[1].mxu0  ;;  %v192_v31 = vpop.f32.mrb[1].mxu1 }
 0x180   :  { %v183_v32 = vadd.f32 %v182_v30, %v125_v22  ;;  %v193_v33 = vadd.f32 %v192_v31, %v133_v23  ;;  %v184_v34 = vpop.f32.mrb[2].mxu0  ;;  %v194_v35 = vpop.f32.mrb[2].mxu1 }
 0x181   :  { %v199_v2 = vmul.f32 0.5, %v181_v28  ;;  %v203_v3 = vmul.f32 0.5, %v191_v29  ;;  %v185_v6 = vadd.f32 %v184_v34, %v129_v25  ;;  %v195_v36 = vadd.f32 %v194_v35, %v137_v24  ;;  %v186_v4 = vpop.f32.mrb[3].mxu0  ;;  %v196_v5 = vpop.f32.mrb[3].mxu1 }
 0x182   :  { %v200_v8 = vmul.f32 0.5, %v183_v32  ;;  %v204_v37 = vmul.f32 0.5, %v193_v33  ;;  %v187_v38 = vadd.f32 %v186_v4, %v129_v25  ;;  %v197_v39 = vadd.f32 %v196_v5, %v137_v24 }
 0x183   :  { %353 = vtanh.f32 %v199_v2  ;;  %v201_v40 = vmul.f32 0.5, %v185_v6  ;;  %v205_v41 = vmul.f32 0.5, %v195_v36 }
 0x184   :  { %355 = vtanh.f32 %v203_v3  ;;  %v202_v42 = vmul.f32 0.5, %v187_v38  ;;  %v206_v43 = vmul.f32 0.5, %v197_v39 }
 0x185   :  { %357 = vtanh.f32 %v200_v8  ;;  %v278_v8 = vstv %s467_s2 }
 0x186   :  { %359 = vtanh.f32 %v204_v37 }
 0x187   :  { %361 = vtanh.f32 %v201_v40 }
 0x188   :  { %363 = vtanh.f32 %v205_v41 }
 0x189   :  { %365 = vtanh.f32 %v202_v42 }
 0x18a   :  { %367 = vtanh.f32 %v206_v43 }
 0x18d   :  { %v354_v44 = vpop.eup %353 }
 0x18e   :  { %v356_v45 = vpop.eup %355  ;;  %v215_v46 = vmul.f32 0.5, %v354_v44 }
 0x18f   :  { %v358_v47 = vpop.eup %357  ;;  %v219_v51 = vmul.f32 0.5, %v356_v45  ;;  %v378_v45 = vmov 1966171168  }
 0x190   :  { %v360_v49 = vpop.eup %359  ;;  %v216_v50 = vmul.f32 0.5, %v358_v47  ;;  %v223_v57 = vadd.f32 0.5, %v215_v46  ;;  %v293_v46 = vunpack.c.l.s4 %v378_v45 }
 0x191   :  { %v362_v52 = vpop.eup %361  ;;  %v220_v54 = vmul.f32 0.5, %v360_v49  ;;  %v227_v0 = vadd.f32 0.5, %v219_v51 }
 0x192   :  { %v364_v55 = vpop.eup %363  ;;  %v217_v56 = vmul.f32 0.5, %v362_v52  ;;  %v224_v58 = vadd.f32 0.5, %v216_v50  ;;  %v247_v15 = vmul.f32 %v233_v53, %v223_v57 }
 0x193   :  { %v366_v59 = vpop.eup %365  ;;  %v221_v60 = vmul.f32 0.5, %v364_v55  ;;  %v228_v1 = vadd.f32 0.5, %v220_v54  ;;  %v251_v21 = vmul.f32 %v241_v9, %v227_v0 }
 0x194   :  { %v368_v61 = vpop.eup %367  ;;  %v218_v62 = vmul.f32 0.5, %v366_v59  ;;  %v225_v63 = vadd.f32 0.5, %v217_v56  ;;  %v248_v7 = vmul.f32 %v233_v53, %v224_v58 }
 0x195   :  { %v222_v10 = vmul.f32 0.5, %v368_v61  ;;  %v229_v16 = vadd.f32 0.5, %v221_v60  ;;  %v252_v22 = vmul.f32 %v241_v9, %v228_v1 }
 0x196   :  { %v226_v13 = vadd.f32 0.5, %v218_v62  ;;  %v249_v14 = vmul.f32 %v237_v48, %v225_v63  ;;  %v265_v23 = vsel %vm264_vm1, %v248_v7, 0.0 }
 0x197   :  { %v230_v18 = vadd.f32 0.5, %v222_v10  ;;  %v253_v26 = vmul.f32 %v245_v17, %v229_v16  ;;  %v268_v29 = vsel %vm264_vm1, %v252_v22, 0.0 }
 0x198   :  { %v250_v19 = vmul.f32 %v237_v48, %v226_v13  ;;  %v255_v20 = vadd.f32 %v249_v14, %v247_v15  ;;  %v294_v48 = vunpack.c.0.s8 %v293_v46 }
 0x199   :  { %v254_v27 = vmul.f32 %v245_v17, %v230_v18 }
 0x19a   :  { %v266_v24 = vsel %vm264_vm1, %v250_v19, 0.0  ;;  %v256_v25 = vadd.f32 %v255_v20, %v251_v21  ;;  %v297_v52 = vsub.s32 %v294_v48, %v440_v12 }
 0x19b   :  { %v267_v28 = vadd.f32 %v266_v24, %v265_v23  ;;  %v270_v33 = vsel %vm264_vm1, %v254_v27, 0.0 }
 0x19c   :  { %v257_v30 = vadd.f32 %v256_v25, %v253_v26 }
 0x19d   :  { %v269_v31 = vadd.f32 %v268_v29, %v267_v28 }
 0x19e   :  { %v258_v32 = vrot.slane %v257_v30, 4 }
 0x19f   :  { %v271_v34 = vadd.f32 %v270_v33, %v269_v31 }
 0x1a0   :  { %v259_v35 = vadd.f32 %v258_v32, %v257_v30 }
 0x1a1   :  { %v272_v2 = vrot.slane %v271_v34, 4 }
 0x1a2   :  { %v260_v3 = vrot.slane %v259_v35, 2 }
 0x1a3   :  { %v273_v6 = vadd.f32 %v272_v2, %v271_v34 }
 0x1a4   :  { %v261_v36 = vadd.f32 %v260_v3, %v259_v35 }
 0x1a5   :  { %v274_v4 = vrot.slane %v273_v6, 2 }
 0x1a6   :  { %v262_v5 = vrot.slane %v261_v36, 1 }
 0x1a7   :  { %v275_v37 = vadd.f32 %v274_v4, %v273_v6 }
 0x1a8   :  { %v263_v38 = vadd.f32 %v262_v5, %v261_v36 }
 0x1a9   :  { %v276_v39 = vrot.slane %v275_v37, 1 }
 0x1aa   :  { %v279_v40 = vadd.f32 %v278_v8, %v263_v38 }
 0x1ab   :  { %v277_v41 = vadd.f32 %v276_v39, %v275_v37 }
 0x1ac   :  { %v281_v42 = vmul.f32 0.5, %v279_v40 }
 0x1ad   :  { %v280_v43 = vadd.f32 %v278_v8, %v277_v41 }
 0x1ae   :  { %369 = vtanh.f32 %v281_v42 }
 0x1af   :  { %v282_v44 = vmul.f32 0.5, %v280_v43 }
 0x1b1   :  { %371 = vtanh.f32 %v282_v44 }
 0x1b8   :  { %v370_v47 = vpop.eup %369 }
 0x1b9   :  { %v285_v49 = vmul.f32 0.5, %v370_v47 }
 0x1bb   :  { %v372_v50 = vpop.eup %371  ;;  %v287_v53 = vadd.f32 0.5, %v285_v49 }
 0x1bc   :  { %v286_v51 = vmul.f32 0.5, %v372_v50 }
 0x1be   :  { %v288_v54 = vadd.f32 0.5, %v286_v51 }
 0x1c0   :  { %v291_v55 = vcombine.low %v287_v53, %v288_v54 }
 0x1c2   :  { %v298_v56 = vrot.slane %v291_v55, %v297_v52 }
 0x1c4   :  { %v305_v57 = vrot.slane %v298_v56, %v297_v52 }
 0x1c6   :  { %311 = vst.msk [vmem:[%s468_s3] sm:$0x3] %vm309_vm2, %v305_v57 }

</bundles_post_ra>
